<compile_context>
chip_gen: v5e
topology: v5e:2x2
jax: 0.10.0
libtpu: 0.0.40
codegen_flags: <defaults>
</compile_context>

<pallas_src>
import numpy as np
import jax
import jax.numpy as jnp
from jax.experimental import pallas as pl
from jax.experimental.pallas import tpu as pltpu

# ----------------------- module configuration (AMS defaults) -----------------------
PATCH_SIZE = (8, 6, 4, 2)
NUM_EXPERTS = len(PATCH_SIZE)      # 4
TOP_K = 4                          # k == num_experts -> every expert selected
DECOMP_KERNELS = (4, 8, 12)        # series_decomp_multi kernel sizes


def build_trend_matrix(L):
    """Fold series_decomp_multi (assumed: unweighted mean of replicate-padded moving
    averages, kernels [4,8,12] — the decomp source is not in the provided spec) plus the
    `x + trend` residual into one [L, L] operator:  new_x = TM @ x0 along the time axis."""
    A = np.zeros((L, L), dtype=np.float32)
    for ksz in DECOMP_KERNELS:
        front = ksz - 1 - (ksz - 1) // 2          # length-preserving replicate padding
        Ak = np.zeros((L, L), dtype=np.float32)
        for p in range(L):
            for off in range(ksz):
                src = min(max(p + off - front, 0), L - 1)
                Ak[p, src] += 1.0 / ksz
        A += Ak
    A /= float(len(DECOMP_KERNELS))
    return np.eye(L, dtype=np.float32) + A        # new_x = (I + trend_op) @ x0


# ------------------- single fused Pallas kernel: gating + experts -------------------
# TODO(synk): Transformer_Layer (patch attention over v_q) is not in the provided source;
#             each expert is realized as a d_model->d_ff->d_model GELU FFN and v_q is unused.
def ams_fused_kernel(x_ref, p_ref, r_ref, wrow_ref, bg_ref,
                     w1_ref, b1_ref, gsel_ref, w2_ref, b2_ref,
                     o_ref, gates_ref):
    x = x_ref[...]                                                   # [ROWS, D] f32

    # ---------- gating for the TB batches of this group (tiny, all f32) ----------
    # logits[t,e] = sum_{r in batch t} x[r,0] * wrow[r,e] + bg_eff[e]
    # (trend decomposition, start_linear and w_gate are folded into wrow / bg_eff).
    c = x[:, 0:1]                                                    # column 0 == x[..., 0]
    weighted = c * wrow_ref[...]                                     # [ROWS, E]
    logits = jnp.dot(p_ref[...], weighted,
                     preferred_element_type=jnp.float32) + bg_ref[...]   # [TB, E]
    m = jnp.max(logits, axis=-1, keepdims=True)
    e = jnp.exp(logits - m)
    g = e * pl.reciprocal(jnp.sum(e, axis=-1, keepdims=True), approx=True)  # [TB, E]
    gates_ref[0] = g                                                 # -> gates[group]

    # ------- expand per-batch gates to per-row hidden scales / output biases -------
    grows = jnp.dot(r_ref[...], g, preferred_element_type=jnp.float32)        # [ROWS, E]
    gvec = jnp.dot(grows, gsel_ref[...], preferred_element_type=jnp.float32)  # [ROWS, E*F]
    yb = jnp.dot(grows, b2_ref[...], preferred_element_type=jnp.float32)      # [ROWS, D]

    # ------- all experts: two stacked matmuls (bf16 MXU operands, f32 accumulate) -------
    xb = x.astype(jnp.bfloat16)
    h = jnp.dot(xb, w1_ref[...], preferred_element_type=jnp.float32) + b1_ref[...]  # [ROWS, E*F]
    h = jax.nn.gelu(h)                               # f32 GELU (kept f32: v5e has no bf16 EUP)
    hs = (h * gvec).astype(jnp.bfloat16)             # gate applied on each expert's F-slice
    y = jnp.dot(hs, w2_ref[...], preferred_element_type=jnp.float32)                # [ROWS, D]
    o_ref[...] = (y + yb + x).astype(o_ref.dtype)    # gated expert biases + residual


def _pick_batches_per_step(B, LN):
    """Batches per grid step: fill the MXU M-dim (target >=256 rows/step, amortizes the
    ~0.35us/step overhead), keep >=2 grid steps when B>=2 (v7x megacore), bound the f32
    hidden activation VMEM, keep the row block 8-aligned, and require TB | B."""
    target = max(1, -(-256 // LN))              # ceil(256 / LN)
    cap_vmem = max(1, 2048 // LN)               # <= 2048 rows/step -> h f32 <= 2 MiB
    cap_cores = B // 2 if B >= 2 else 1
    tb_max = max(1, min(B, target, cap_vmem, max(1, cap_cores)))
    for tb in range(tb_max, 0, -1):
        if B % tb == 0 and (tb * LN) % 8 == 0:
            return tb
    return B                                    # single full-array group (always layout-legal)


def ams_fused(x2d, kp, B, LN):
    M, D = x2d.shape
    E, EF = kp["gsel"].shape
    TB = _pick_batches_per_step(B, LN)
    G = B // TB
    ROWS = TB * LN

    # tiny constant helper matrices (row <-> batch mapping inside a group)
    P = jnp.asarray(np.repeat(np.eye(TB, dtype=np.float32), LN, axis=1))   # [TB, ROWS]
    R = jnp.asarray(np.repeat(np.eye(TB, dtype=np.float32), LN, axis=0))   # [ROWS, TB]
    wrow_t = jnp.tile(kp["wrow"], (TB, 1))                                 # [ROWS, E]

    grid_spec = pltpu.PrefetchScalarGridSpec(
        num_scalar_prefetch=0,
        grid=(G,),                                           # groups of TB batches (independent)
        in_specs=[
            pl.BlockSpec((ROWS, D), lambda g: (g, 0)),       # x rows of this batch group
            pl.BlockSpec((TB, ROWS), lambda g: (0, 0)),      # row -> batch pooling (P)
            pl.BlockSpec((ROWS, TB), lambda g: (0, 0)),      # batch -> row expansion (R)
            pl.BlockSpec((ROWS, E), lambda g: (0, 0)),       # folded trend/start_linear/w_gate
            pl.BlockSpec((1, E), lambda g: (0, 0)),          # folded gate bias
            pl.BlockSpec((D, EF), lambda g: (0, 0)),         # stacked W1 (bf16)
            pl.BlockSpec((1, EF), lambda g: (0, 0)),         # stacked b1
            pl.BlockSpec((E, EF), lambda g: (0, 0)),         # gate -> hidden-column selector
            pl.BlockSpec((EF, D), lambda g: (0, 0)),         # stacked W2 (bf16)
            pl.BlockSpec((E, D), lambda g: (0, 0)),          # stacked b2
        ],
        out_specs=(
            pl.BlockSpec((ROWS, D), lambda g: (g, 0)),       # MoE output rows of this group
            pl.BlockSpec((1, TB, E), lambda g: (g, 0, 0)),   # gates of this group
        ),
    )
    out2d, gates3 = pl.pallas_call(
        ams_fused_kernel,
        out_shape=(jax.ShapeDtypeStruct((M, D), jnp.float32),
                   jax.ShapeDtypeStruct((G, TB, E), jnp.float32)),
        grid_spec=grid_spec,
        input_output_aliases={0: 0},                         # in-place over (donated) x2d
        compiler_params=pltpu.CompilerParams(
            dimension_semantics=("parallel",)),              # megacore-shardable on v7x
    )(x2d, P, R, wrow_t, kp["bg_eff"], kp["w1s"], kp["b1s"],
      kp["gsel"], kp["w2s"], kp["b2s"])
    return out2d, gates3.reshape(B, E)


# ----------------------------------- glue / wrapper -----------------------------------
def cv_squared(v):
    eps = 1e-10
    if v.shape[0] == 1:
        return jnp.zeros((), v.dtype)
    return jnp.var(v, ddof=1) / (jnp.mean(v) ** 2 + eps)


def _ams_forward(params, x, v_q, loss_coef=0.01):
    del v_q   # TODO(synk): v_q is consumed by Transformer_Layer, which is unavailable.
    B, L, N, D = x.shape
    x2d = x.reshape(B * L * N, D)
    out2d, gates = ams_fused(x2d, params, B, L * N)
    importance = gates.sum(0)
    load = (gates > 0).sum(0).astype(jnp.float32)
    balance_loss = (cv_squared(importance) + cv_squared(load)) * loss_coef
    return out2d.reshape(B, L, N, D), balance_loss


# donate x so the pallas input/output alias is a true in-place write (no defensive copy)
ams_forward = jax.jit(_ams_forward, donate_argnums=(1,))


def init_params(key, L, N, D, F, E):
    ks = jax.random.split(key, 7)
    ws = jax.random.normal(ks[0], (N, 1), jnp.float32) * 0.1     # start_linear.weight^T
    bs = jnp.float32(0.01)                                       # start_linear.bias
    wg = jax.random.normal(ks[1], (E, L), jnp.float32) * 0.1     # w_gate.weight
    bg = jax.random.normal(ks[2], (E,), jnp.float32) * 0.1       # w_gate.bias
    w1 = jax.random.normal(ks[3], (E, D, F), jnp.float32) * 0.05 # expert FFN (in)
    b1 = jax.random.normal(ks[4], (E, F), jnp.float32) * 0.05
    w2 = jax.random.normal(ks[5], (E, F, D), jnp.float32) * 0.05 # expert FFN (out)
    b2 = jax.random.normal(ks[6], (E, D), jnp.float32) * 0.05

    TM = jnp.asarray(build_trend_matrix(L))                      # new_x = TM @ x0 (time axis)
    wgt = wg.T                                                   # [L, E]
    # exact one-time folds:  logits = ((TM @ z0) + bs) @ wgt + bg
    #                               = z0 @ (TM^T @ wgt) + (bg + bs * 1^T wgt)
    wge = TM.T @ wgt                                             # [L, E]
    bg_eff = (bg + bs * jnp.sum(wgt, axis=0)).reshape(1, E)
    # per-(l, n) gating row weights: wrow[l*N+n, e] = ws[n] * wge[l, e]
    wrow = (wge[:, None, :] * ws[None, :, :]).reshape(L * N, E)

    # stacked expert weights: column block e of w1s / row block e of w2s == expert e
    w1s = jnp.transpose(w1, (1, 0, 2)).reshape(D, E * F).astype(jnp.bfloat16)
    b1s = b1.reshape(1, E * F)
    w2s = w2.reshape(E * F, D).astype(jnp.bfloat16)
    gsel = jnp.repeat(jnp.eye(E, dtype=jnp.float32), F, axis=1)  # [E, E*F] gate expander

    kernel_params = dict(wrow=wrow, bg_eff=bg_eff, w1s=w1s, b1s=b1s,
                         gsel=gsel, w2s=w2s, b2s=b2)
    raw_params = dict(ws=ws, bs=bs, wg=wg, bg=bg, w1=w1, b1=b1, w2=w2, b2=b2, TM=TM)
    return kernel_params, raw_params


def reference_forward(raw, x, loss_coef=0.01):
    """Pure-JAX f32 reference with identical semantics (tolerance check)."""
    B, L, N, D = x.shape
    E = raw["w1"].shape[0]
    x0 = x[..., 0]                                               # [B, L, N]
    new_x = jnp.einsum("pl,bln->bpn", raw["TM"], x0)             # x0 + trend(x0)
    z = jnp.einsum("bln,no->bl", new_x, raw["ws"]) + raw["bs"]   # start_linear
    logits = z @ raw["wg"].T + raw["bg"]
    gates = jax.nn.softmax(logits, axis=1)                       # k == E -> dense softmax
    x2 = x.reshape(B * L * N, D)
    g_rows = jnp.repeat(gates, L * N, axis=0)
    out = jnp.zeros_like(x2)
    for e in range(E):
        h = jax.nn.gelu(x2 @ raw["w1"][e] + raw["b1"][e])
        out = out + g_rows[:, e:e + 1] * (h @ raw["w2"][e] + raw["b2"][e])
    out = out + x2                                               # residual
    importance = gates.sum(0)
    load = (gates > 0).sum(0).astype(jnp.float32)
    loss = (cv_squared(importance) + cv_squared(load)) * loss_coef
    return out.reshape(B, L, N, D), loss


if __name__ == "__main__":
    # input_size=16, num_nodes=1, d_model=32, d_ff=64, num_experts=4 (k=4)
    B, L, N, D, F, E = 2, 16, 1, 32, 64, NUM_EXPERTS
    key = jax.random.PRNGKey(0)
    kx, kv, kp = jax.random.split(key, 3)
    x = jax.random.normal(kx, (B, L, N, D), jnp.float32)
    v_q = jax.random.normal(kv, (B, 8, D), jnp.float32)          # visual query (unused)
    params, raw = init_params(kp, L, N, D, F, E)

    # compute the pure-JAX reference FIRST: x is donated to the Pallas call below.
    ref_out, ref_loss = reference_forward(raw, x)
    ref_out, ref_loss = np.asarray(ref_out), float(ref_loss)

    output, balance_loss = ams_forward(params, x, v_q)
    jax.block_until_ready((output, balance_loss))
    assert output.shape == (B, L, N, D)
    assert balance_loss.shape == ()

    # loose tolerance: kernel uses bf16 MXU operands with f32 accumulation / elementwise
    np.testing.assert_allclose(np.asarray(output), ref_out, rtol=2e-2, atol=2e-2)
    np.testing.assert_allclose(float(balance_loss), ref_loss, rtol=2e-2, atol=1e-4)
    print("KERNEL_OK")
</pallas_src>

<mosaic_0001>
module attributes {stable_mosaic.version = 11 : i64} {
  func.func @ams_fused_kernel(%arg0: i32, %arg1: memref<16x32xf32, #tpu.memory_space<vmem>>, %arg2: memref<1x16xf32, #tpu.memory_space<vmem>>, %arg3: memref<16x1xf32, #tpu.memory_space<vmem>>, %arg4: memref<16x4xf32, #tpu.memory_space<vmem>>, %arg5: memref<1x4xf32, #tpu.memory_space<vmem>>, %arg6: memref<32x256xbf16, #tpu.memory_space<vmem>>, %arg7: memref<1x256xf32, #tpu.memory_space<vmem>>, %arg8: memref<4x256xf32, #tpu.memory_space<vmem>>, %arg9: memref<256x32xbf16, #tpu.memory_space<vmem>>, %arg10: memref<4x32xf32, #tpu.memory_space<vmem>>, %arg11: memref<16x32xf32, #tpu.memory_space<vmem>>, %arg12: memref<1x1x4xf32, #tpu.memory_space<vmem>>) attributes {dimension_semantics = [#tpu.dimension_semantics<parallel>], iteration_bounds = array<i64: 2>, scalar_prefetch = 0 : i64, scratch_operands = 0 : i64, tpu.core_type = #tpu.core_type<tc>, window_params = [{transform_indices = @transform_0, window_bounds = array<i64: 16, 32>}, {pipeline_mode = #tpu.pipeline_mode<synchronous>, transform_indices = @transform_1, window_bounds = array<i64: 1, 16>}, {pipeline_mode = #tpu.pipeline_mode<synchronous>, transform_indices = @transform_2, window_bounds = array<i64: 16, 1>}, {pipeline_mode = #tpu.pipeline_mode<synchronous>, transform_indices = @transform_3, window_bounds = array<i64: 16, 4>}, {pipeline_mode = #tpu.pipeline_mode<synchronous>, transform_indices = @transform_4, window_bounds = array<i64: 1, 4>}, {pipeline_mode = #tpu.pipeline_mode<synchronous>, transform_indices = @transform_5, window_bounds = array<i64: 32, 256>}, {pipeline_mode = #tpu.pipeline_mode<synchronous>, transform_indices = @transform_6, window_bounds = array<i64: 1, 256>}, {pipeline_mode = #tpu.pipeline_mode<synchronous>, transform_indices = @transform_7, window_bounds = array<i64: 4, 256>}, {pipeline_mode = #tpu.pipeline_mode<synchronous>, transform_indices = @transform_8, window_bounds = array<i64: 256, 32>}, {pipeline_mode = #tpu.pipeline_mode<synchronous>, transform_indices = @transform_9, window_bounds = array<i64: 4, 32>}, {transform_indices = @transform_10, window_bounds = array<i64: 16, 32>}, {transform_indices = @transform_11, window_bounds = array<i64: 1, 1, 4>}]} {
    %c0 = arith.constant 0 : index
    %c0_0 = arith.constant 0 : index
    %0 = vector.load %arg1[%c0, %c0_0] : memref<16x32xf32, #tpu.memory_space<vmem>>, vector<16x32xf32>
    %1 = vector.extract_strided_slice %0 {offsets = [0, 0], sizes = [16, 1], strides = [1, 1]} : vector<16x32xf32> to vector<16x1xf32>
    %c0_1 = arith.constant 0 : index
    %c0_2 = arith.constant 0 : index
    %2 = vector.load %arg4[%c0_1, %c0_2] : memref<16x4xf32, #tpu.memory_space<vmem>>, vector<16x4xf32>
    %3 = vector.broadcast %1 : vector<16x1xf32> to vector<16x4xf32>
    %4 = arith.mulf %3, %2 : vector<16x4xf32>
    %c0_3 = arith.constant 0 : index
    %c0_4 = arith.constant 0 : index
    %5 = vector.load %arg2[%c0_3, %c0_4] : memref<1x16xf32, #tpu.memory_space<vmem>>, vector<1x16xf32>
    %cst = arith.constant dense<0.000000e+00> : vector<1x4xf32>
    %6 = tpu.matmul %5, %4, %cst {dimension_numbers = #tpu.dot_dimension_numbers<[1], [0], [0], [1], [0, 0, 1, 1], [], []>} : vector<1x16xf32>, vector<16x4xf32>, vector<1x4xf32> -> vector<1x4xf32>
    %c0_5 = arith.constant 0 : index
    %c0_6 = arith.constant 0 : index
    %7 = vector.load %arg5[%c0_5, %c0_6] : memref<1x4xf32, #tpu.memory_space<vmem>>, vector<1x4xf32>
    %8 = arith.addf %6, %7 : vector<1x4xf32>
    %cst_7 = arith.constant dense<0xFF800000> : vector<1xf32>
    %9 = vector.multi_reduction <maximumf>, %8, %cst_7 [1] : vector<1x4xf32> to vector<1xf32>
    %10 = vector.shape_cast %9 : vector<1xf32> to vector<1x1xf32>
    %11 = vector.broadcast %10 : vector<1x1xf32> to vector<1x4xf32>
    %12 = arith.subf %8, %11 : vector<1x4xf32>
    %13 = math.exp %12 : vector<1x4xf32>
    %cst_8 = arith.constant dense<0.000000e+00> : vector<1xf32>
    %14 = vector.multi_reduction <add>, %13, %cst_8 [1] : vector<1x4xf32> to vector<1xf32>
    %15 = vector.shape_cast %14 : vector<1xf32> to vector<1x1xf32>
    %16 = tpu.reciprocal %15 {approx = true} : vector<1x1xf32> -> vector<1x1xf32>
    %17 = vector.broadcast %16 : vector<1x1xf32> to vector<1x4xf32>
    %18 = arith.mulf %13, %17 : vector<1x4xf32>
    %c0_9 = arith.constant 0 : index
    %c0_10 = arith.constant 0 : index
    %c0_11 = arith.constant 0 : index
    %19 = vector.load %arg12[%c0_9, %c0_10, %c0_11] : memref<1x1x4xf32, #tpu.memory_space<vmem>>, vector<1x1x4xf32>
    %20 = vector.shape_cast %19 : vector<1x1x4xf32> to vector<1x4xf32>
    %21 = vector.shape_cast %18 : vector<1x4xf32> to vector<1x1x4xf32>
    tpu.vector_store %arg12[%c0_9, %c0_10, %c0_11], %21 {strides = array<i32>} : memref<1x1x4xf32, #tpu.memory_space<vmem>>, vector<1x1x4xf32>,
    %c0_12 = arith.constant 0 : index
    %c0_13 = arith.constant 0 : index
    %22 = vector.load %arg3[%c0_12, %c0_13] : memref<16x1xf32, #tpu.memory_space<vmem>>, vector<16x1xf32>
    %cst_14 = arith.constant dense<0.000000e+00> : vector<16x4xf32>
    %23 = tpu.matmul %22, %18, %cst_14 {dimension_numbers = #tpu.dot_dimension_numbers<[1], [0], [0], [1], [0, 0, 1, 1], [], []>} : vector<16x1xf32>, vector<1x4xf32>, vector<16x4xf32> -> vector<16x4xf32>
    %c0_15 = arith.constant 0 : index
    %c0_16 = arith.constant 0 : index
    %24 = vector.load %arg8[%c0_15, %c0_16] : memref<4x256xf32, #tpu.memory_space<vmem>>, vector<4x256xf32>
    %cst_17 = arith.constant dense<0.000000e+00> : vector<16x256xf32>
    %25 = tpu.matmul %23, %24, %cst_17 {dimension_numbers = #tpu.dot_dimension_numbers<[1], [0], [0], [1], [0, 0, 1, 1], [], []>} : vector<16x4xf32>, vector<4x256xf32>, vector<16x256xf32> -> vector<16x256xf32>
    %c0_18 = arith.constant 0 : index
    %c0_19 = arith.constant 0 : index
    %26 = vector.load %arg10[%c0_18, %c0_19] : memref<4x32xf32, #tpu.memory_space<vmem>>, vector<4x32xf32>
    %cst_20 = arith.constant dense<0.000000e+00> : vector<16x32xf32>
    %27 = tpu.matmul %23, %26, %cst_20 {dimension_numbers = #tpu.dot_dimension_numbers<[1], [0], [0], [1], [0, 0, 1, 1], [], []>} : vector<16x4xf32>, vector<4x32xf32>, vector<16x32xf32> -> vector<16x32xf32>
    %28 = arith.truncf %0 : vector<16x32xf32> to vector<16x32xbf16>
    %c0_21 = arith.constant 0 : index
    %c0_22 = arith.constant 0 : index
    %29 = vector.load %arg6[%c0_21, %c0_22] : memref<32x256xbf16, #tpu.memory_space<vmem>>, vector<32x256xbf16>
    %cst_23 = arith.constant dense<0.000000e+00> : vector<16x256xf32>
    %30 = tpu.matmul %28, %29, %cst_23 {dimension_numbers = #tpu.dot_dimension_numbers<[1], [0], [0], [1], [0, 0, 1, 1], [], []>} : vector<16x32xbf16>, vector<32x256xbf16>, vector<16x256xf32> -> vector<16x256xf32>
    %c0_24 = arith.constant 0 : index
    %c0_25 = arith.constant 0 : index
    %31 = vector.load %arg7[%c0_24, %c0_25] : memref<1x256xf32, #tpu.memory_space<vmem>>, vector<1x256xf32>
    %32 = vector.broadcast %31 : vector<1x256xf32> to vector<16x256xf32>
    %33 = arith.addf %30, %32 : vector<16x256xf32>
    %34 = arith.mulf %33, %33 : vector<16x256xf32>
    %35 = arith.mulf %33, %34 : vector<16x256xf32>
    %cst_26 = arith.constant 4.471500e-02 : f32
    %36 = vector.broadcast %cst_26 : f32 to vector<16x256xf32>
    %37 = arith.mulf %36, %35 : vector<16x256xf32>
    %38 = arith.addf %33, %37 : vector<16x256xf32>
    %cst_27 = arith.constant 0.797884583 : f32
    %39 = vector.broadcast %cst_27 : f32 to vector<16x256xf32>
    %40 = arith.mulf %39, %38 : vector<16x256xf32>
    %41 = math.tanh %40 : vector<16x256xf32>
    %cst_28 = arith.constant 1.000000e+00 : f32
    %42 = vector.broadcast %cst_28 : f32 to vector<16x256xf32>
    %43 = arith.addf %42, %41 : vector<16x256xf32>
    %cst_29 = arith.constant 5.000000e-01 : f32
    %44 = vector.broadcast %cst_29 : f32 to vector<16x256xf32>
    %45 = arith.mulf %44, %43 : vector<16x256xf32>
    %46 = arith.mulf %33, %45 : vector<16x256xf32>
    %47 = arith.mulf %46, %25 : vector<16x256xf32>
    %48 = arith.truncf %47 : vector<16x256xf32> to vector<16x256xbf16>
    %c0_30 = arith.constant 0 : index
    %c0_31 = arith.constant 0 : index
    %49 = vector.load %arg9[%c0_30, %c0_31] : memref<256x32xbf16, #tpu.memory_space<vmem>>, vector<256x32xbf16>
    %cst_32 = arith.constant dense<0.000000e+00> : vector<16x32xf32>
    %50 = tpu.matmul %48, %49, %cst_32 {dimension_numbers = #tpu.dot_dimension_numbers<[1], [0], [0], [1], [0, 0, 1, 1], [], []>} : vector<16x256xbf16>, vector<256x32xbf16>, vector<16x32xf32> -> vector<16x32xf32>
    %51 = arith.addf %50, %27 : vector<16x32xf32>
    %52 = arith.addf %51, %0 : vector<16x32xf32>
    %c0_33 = arith.constant 0 : index
    %c0_34 = arith.constant 0 : index
    %53 = vector.load %arg11[%c0_33, %c0_34] : memref<16x32xf32, #tpu.memory_space<vmem>>, vector<16x32xf32>
    tpu.vector_store %arg11[%c0_33, %c0_34], %52 {strides = array<i32>} : memref<16x32xf32, #tpu.memory_space<vmem>>, vector<16x32xf32>,
    return
  }
  func.func @transform_0(%arg0: i32) -> (i32, i32) {
    %c0_i32 = arith.constant 0 : i32
    %c0_i32_0 = arith.constant 0 : i32
    return %arg0, %c0_i32 : i32, i32
  }
  func.func @transform_1(%arg0: i32) -> (i32, i32) {
    %c0_i32 = arith.constant 0 : i32
    %c0_i32_0 = arith.constant 0 : i32
    %c0_i32_1 = arith.constant 0 : i32
    return %c0_i32, %c0_i32_0 : i32, i32
  }
  func.func @transform_2(%arg0: i32) -> (i32, i32) {
    %c0_i32 = arith.constant 0 : i32
    %c0_i32_0 = arith.constant 0 : i32
    %c0_i32_1 = arith.constant 0 : i32
    return %c0_i32, %c0_i32_0 : i32, i32
  }
  func.func @transform_3(%arg0: i32) -> (i32, i32) {
    %c0_i32 = arith.constant 0 : i32
    %c0_i32_0 = arith.constant 0 : i32
    %c0_i32_1 = arith.constant 0 : i32
    return %c0_i32, %c0_i32_0 : i32, i32
  }
  func.func @transform_4(%arg0: i32) -> (i32, i32) {
    %c0_i32 = arith.constant 0 : i32
    %c0_i32_0 = arith.constant 0 : i32
    %c0_i32_1 = arith.constant 0 : i32
    return %c0_i32, %c0_i32_0 : i32, i32
  }
  func.func @transform_5(%arg0: i32) -> (i32, i32) {
    %c0_i32 = arith.constant 0 : i32
    %c0_i32_0 = arith.constant 0 : i32
    %c0_i32_1 = arith.constant 0 : i32
    return %c0_i32, %c0_i32_0 : i32, i32
  }
  func.func @transform_6(%arg0: i32) -> (i32, i32) {
    %c0_i32 = arith.constant 0 : i32
    %c0_i32_0 = arith.constant 0 : i32
    %c0_i32_1 = arith.constant 0 : i32
    return %c0_i32, %c0_i32_0 : i32, i32
  }
  func.func @transform_7(%arg0: i32) -> (i32, i32) {
    %c0_i32 = arith.constant 0 : i32
    %c0_i32_0 = arith.constant 0 : i32
    %c0_i32_1 = arith.constant 0 : i32
    return %c0_i32, %c0_i32_0 : i32, i32
  }
  func.func @transform_8(%arg0: i32) -> (i32, i32) {
    %c0_i32 = arith.constant 0 : i32
    %c0_i32_0 = arith.constant 0 : i32
    %c0_i32_1 = arith.constant 0 : i32
    return %c0_i32, %c0_i32_0 : i32, i32
  }
  func.func @transform_9(%arg0: i32) -> (i32, i32) {
    %c0_i32 = arith.constant 0 : i32
    %c0_i32_0 = arith.constant 0 : i32
    %c0_i32_1 = arith.constant 0 : i32
    return %c0_i32, %c0_i32_0 : i32, i32
  }
  func.func @transform_10(%arg0: i32) -> (i32, i32) {
    %c0_i32 = arith.constant 0 : i32
    %c0_i32_0 = arith.constant 0 : i32
    return %arg0, %c0_i32 : i32, i32
  }
  func.func @transform_11(%arg0: i32) -> (i32, i32, i32) {
    %c0_i32 = arith.constant 0 : i32
    %c0_i32_0 = arith.constant 0 : i32
    %c0_i32_1 = arith.constant 0 : i32
    return %arg0, %c0_i32, %c0_i32_0 : i32, i32, i32
  }
}

</mosaic_0001>

<bundles_post_ra>
// kernel: _ams_forward.1
= control target key start
LH: loop header
LB: loop body
LE: loop exit
PB: predicated region body
PF: predicated region fallthrough
CT: control target
= control target key end

     0   :  { %s1144_s17 = smov 0   ;;  %s1292_s0 = inlined_call_operand.vmem [shape: f32[32,32], index: 0, kind: input, shape index: {}, may-alias: {0,10}]   ;;  %s1293_s1 = inlined_call_operand.vmem [shape: f32[1,16], index: 1, kind: input, shape index: {}]   ;;  %s1294_s2 = inlined_call_operand.vmem [shape: f32[16,1], index: 2, kind: input, shape index: {}]   ;;  %s1295_s3 = inlined_call_operand.vmem [shape: f32[16,4], index: 3, kind: input, shape index: {}]   ;;  %s1296_s4 = inlined_call_operand.vmem [shape: f32[1,4], index: 4, kind: input, shape index: {}]   ;;  %s1297_s5 = inlined_call_operand.vmem [shape: bf16[32,256], index: 5, kind: input, shape index: {}]   ;;  %s1298_s6 = inlined_call_operand.vmem [shape: f32[1,256], index: 6, kind: input, shape index: {}]   ;;  %s1299_s7 = inlined_call_operand.vmem [shape: f32[4,256], index: 7, kind: input, shape index: {}]   ;;  %s1300_s8 = inlined_call_operand.vmem [shape: bf16[256,32], index: 8, kind: input, shape index: {}]   ;;  %s1301_s9 = inlined_call_operand.vmem [shape: f32[4,32], index: 9, kind: input, shape index: {}]   ;;  %s1302_s10 = inlined_call_operand.vmem [shape: f32[32,32], index: 10, kind: output, shape index: {0}, may-alias: {0,10}]   ;;  %s1303_s11 = inlined_call_operand.vmem [shape: f32[2,1,4], index: 11, kind: output, shape index: {1}]  }
   0x1 LB: > { %s1150_s18 = sadd.s32 4294967295, %s1081_s17   ;;  %p931_p0 = scmp.ge.s32.totalorder %s1081_s17, 1  ;;  %s1081_s17 = sphi %s1144_s17, %s22_s17  }
   0x2   : > { %p341_p1 = scmp.lt.s32.totalorder %s1081_s17, 3 }
   0x4   : > { %p342_p2 = pnand %p931_p0, %p341_p1 }
   0x5   : > { %s932_s19 = sshll.u32 (!%p342_p2), %s1150_s18, 1  ;;  %p396_p4 = scmp.lt.s32.totalorder (!%p342_p2), %s1150_s18, 1 }
   0x6   : > { %345 = sbr.rel (%p342_p2) target bundleno = 974 (0x3ce), region = 60  ;;  %p385_p3 = scmp.lt.s32.totalorder (!%p342_p2), %s932_s19, 3 }
   0xb   : > { %v1083_v0 = vmov 0   ;;  %s1305_s19 = smov (!%p385_p3, %s932_s19), 3  ;;  %v403_v3 = vld [vmem:[%s1295_s3 + $0x8] sm:$0xff]  ;;  %v402_v6 = vld [vmem:[%s1295_s3] sm:$0xff]  ;;  %vm418_vm0 = vcmask 130048   ;;  %vm442_vm1 = vcmask 24576  }
   0xc   : > { %1062 = vset.pattern.permute.xlu0 %v1083_v0  ;;  %s933_s20 = sshll.u32 %s1305_s19, 3  ;;  %v416_v9 = vld [vmem:[%s1293_s1] sm:$0x1]  ;;  %s1307_s18 = smov (!%p396_p4, %s1150_s18), 1  ;;  %v959_v20 = vld [vmem:[%s1297_s5 + $0x10] sm:$0xf] }
   0xd   : > { %s388_s23 = scalar_lea.vmem %s1292_s0, %s933_s20  ;;  %v417_v10 = vld [vmem:[%s1296_s4] sm:$0x1]  ;;  %v1036_v21 = vld [vmem:[%s1297_s5 + $0x14] sm:$0xf0]  ;;  %vm464_vm2 = vcmask 1040384   ;;  %vm457_vm3 = vcmask 7168   ;;  %s394_s12 = scalar_lea.vmem %s1302_s10, %s933_s20 }
   0xe   : > { %v1163_v1 = vld [vmem:[%s388_s23 + $0x8] sm:$0xff]  ;;  %v1166_v2 = vld [vmem:[%s388_s23] sm:$0xff]  ;;  %s398_s23 = scalar_lea.vmem %s1303_s11, %s1307_s18  ;;  %v960_v25 = vor.u32 %v1036_v21, %v959_v20  ;;  %vm612_vm4 = vcmask 261120   ;;  %vm503_vm5 = vcmask 1043456   ;;  %v1035_v35 = vld [vmem:[%s1297_s5 + $0x14] sm:$0xf] }
   0xf   : > { %411 = vperm.xlu0 %1062, %v1163_v1   ;;  %v455_v24 = vld [vmem:[%s1294_s2] sm:$0xff]  ;;  %v1034_v27 = vld [vmem:[%s1297_s5 + $0x4] sm:$0xf0]  ;;  %v581_v30 = vpack.c.bf16 %v1163_v1, %v1166_v2  ;;  %v961_v36 = vld [vmem:[%s1297_s5 + $0x18] sm:$0xf0]  ;;  %vm496_vm6 = vcmask 31744  }
  0x10   : > { %v951_v26 = vld [vmem:[%s1297_s5] sm:$0xf]  ;;  %v456_v29 = vld [vmem:[%s1294_s2 + $0x8] sm:$0xff]  ;;  %v964_v37 = vor.u32 %v1035_v35, %v961_v36  ;;  %v1033_v38 = vld [vmem:[%s1297_s5 + $0x4] sm:$0xf] }
  0x11   : > { %v952_v28 = vor.u32 %v1034_v27, %v951_v26  ;;  %v491_v31 = vld [vmem:[%s1299_s7] sm:$0xff]  ;;  %v953_v39 = vld [vmem:[%s1297_s5 + $0x8] sm:$0xf0]  ;;  %v1044_v41 = vld [vmem:[%s1300_s8 + $0x38] sm:$0xff] }
  0x12   : > { %493 = vst [vmem:[#allocation1] ss:$2 sm:$0xff] %v491_v31  ;;  %v554_v33 = vld [vmem:[%s1301_s9] sm:$0xf]  ;;  %v956_v40 = vor.u32 %v1033_v38, %v953_v39  ;;  %v1043_v42 = vld [vmem:[%s1300_s8 + $0x30] sm:$0xff]  ;;  %v1042_v44 = vld [vmem:[%s1300_s8 + $0x28] sm:$0xff] }
  0x13   : > { %946 = vmatpush.msk.msra.mxu0 %vm503_vm5, %v554_v33  ;;  %v1041_v45 = vld [vmem:[%s1300_s8 + $0x20] sm:$0xff]  ;;  %v1040_v47 = vld [vmem:[%s1300_s8 + $0x18] sm:$0xff]  ;;  %v1039_v56 = vld [vmem:[%s1300_s8 + $0x10] sm:$0xff] }
  0x14   : > { %v586_v49 = vld [vmem:[%s1298_s6] sm:$0x3]  ;;  %v1038_v58 = vld [vmem:[%s1300_s8 + $0x8] sm:$0xff]  ;;  %v1047_v20 = vld [vmem:[%s1300_s8 + $0x50] sm:$0xff] }
  0x15   : > { %v588_v50 = vperm.slane %v586_v49, 0  ;;  %v1037_v62 = vld [vmem:[%s1300_s8] sm:$0xff] }
  0x16   : > { %v1045_v27 = vld [vmem:[%s1300_s8 + $0x40] sm:$0xff] }
  0x17   : > { %406 = vperm.xlu0 %1062, %v1166_v2  }
  0x19   : > { %v494_v32 = vld.sshfl [vmem:[#allocation1] sm:$0xff pattern:$0x75316420]  ;;  %v495_v34 = vld.sshfl [vmem:[#allocation1 + $0x8] sm:$0xff pattern:$0x75316420] }
  0x1a   : > { %940 = vmatpush.msk.msra.mxu2 %vm503_vm5, %v494_v32  ;;  %943 = vmatpush.msk.msra.mxu3 %vm503_vm5, %v495_v34 }
  0x1c   : > { %636 = vmatpush.bf16.msrb.mxu2 %v964_v37  ;;  %814 = vmatpush.bf16.msrb.mxu3 %v1044_v41 }
  0x20   : > { %637 = vmatpush.bf16.msrb.mxu2 %v956_v40  ;;  %815 = vmatpush.bf16.msrb.mxu3 %v1043_v42 }
  0x24   : > { %816 = vmatpush.bf16.msrb.mxu3 %v1042_v44 }
  0x28   : > { %817 = vmatpush.bf16.msrb.mxu3 %v1041_v45 }
  0x2c   : > { %818 = vmatpush.bf16.msrb.mxu3 %v1040_v47 }
  0x30   : > { %819 = vmatpush.bf16.msrb.mxu3 %v1039_v56 }
  0x34   : > { %820 = vmatpush.bf16.msrb.mxu3 %v1038_v58 }
  0x38   : > { %821 = vmatpush.bf16.msrb.mxu3 %v1037_v62 }
  0x81   : > { %v412_v4 = vpop.permute.xlu0 %411 }
  0x82   : > { %v415_v5 = vmul.f32 %v412_v4, %v403_v3 }
  0x84   : > { %436 = vmatpush.msra.mxu1 %v415_v5  ;;  %v1052_v5 = vld [vmem:[%s1300_s8 + $0x78] sm:$0xff] }
  0x85   : > { %828 = vmatpush.bf16.msrb.mxu0 %v1052_v5 }
  0x89   : > { %v407_v7 = vpop.permute.xlu0 %406 }
  0x8a   : > { %v414_v8 = vmul.f32 %v407_v7, %v402_v6 }
  0x8c   : > { %437 = vmatpush.msra.mxu1 %v414_v8  ;;  %v1051_v8 = vld [vmem:[%s1300_s8 + $0x70] sm:$0xff] }
  0x8d   : > { %936 = vmatmul.msk.f32.vlgmr.msra.gmra.mxu1 %vm418_vm0, %v416_v9  ;;  %829 = vmatpush.bf16.msrb.mxu0 %v1051_v8 }
 0x10a   : > { %v439_v11 = vpop.f32.mrf.mxu1 }
 0x10b   : > { %v440_v12 = vadd.f32 %v439_v11, %v417_v10  ;;  %v1050_v11 = vld [vmem:[%s1300_s8 + $0x68] sm:$0xff] }
 0x10c   : > { %830 = vmatpush.bf16.msrb.mxu0 %v1050_v11 }
 0x10d   : > { %v443_v13 = vsel %vm442_vm1, %v440_v12, -inf }
 0x10e   : > { %444 = vmax.xlane.f32.xlu1 %v443_v13 }
 0x181   : > { %v445_v14 = vpop.xlane.xlu1 %444 }
 0x182   : > { %v446_v15 = vsub.f32 %v440_v12, %v445_v14 }
 0x184   : > { %v447_v16 = vmul.f32 1.442695, %v446_v15  ;;  %v1049_v15 = vld [vmem:[%s1300_s8 + $0x60] sm:$0xff] }
 0x185   : > { %831 = vmatpush.bf16.msrb.mxu0 %v1049_v15 }
 0x186   : > { %1063 = vpow2.f32 %v447_v16 }
 0x18c   : > { %v1064_v17 = vpop.eup %1063 }
 0x18d   : > { %v449_v18 = vsel %vm442_vm1, %v1064_v17, 0.0 }
 0x18e   : > { %450 = vadd.xlane.f32.xlu1 %v449_v18  ;;  %v1048_v18 = vld [vmem:[%s1300_s8 + $0x58] sm:$0xff] }
 0x18f   : > { %832 = vmatpush.bf16.msrb.mxu0 %v1048_v18 }
 0x193   : > { %833 = vmatpush.bf16.msrb.mxu0 %v1047_v20 }
 0x201   : > { %v451_v19 = vpop.xlane.xlu1 %450 }
 0x202   : > { %1065 = vrcp.f32 %v451_v19 }
 0x208   : > { %v1066_v22 = vpop.eup %1065 }
 0x209   : > { %v453_v23 = vmul.f32 %v1066_v22, %v1064_v17 }
 0x20b   : > { %454 = vst.msk [vmem:[%s398_s23] sm:$0x1] %vm442_vm1, %v453_v23  ;;  %937 = vmatpush.msk.msrb.mxu1 %vm464_vm2, %v453_v23 }
 0x20c   : > { %938 = vmatmul.msk.f32.vlgmr.msrb.gmra.mxu1 %vm457_vm3, %v455_v24  ;;  %v1046_v24 = vld [vmem:[%s1300_s8 + $0x48] sm:$0xff] }
 0x20d   : > { %622 = vmatpush.bf16.msra.mxu1 %v960_v25  ;;  %v589_v25 = vperm.slane %v586_v49, 1  ;;  %834 = vmatpush.bf16.msrb.mxu0 %v1046_v24 }
 0x211   : > { %623 = vmatpush.bf16.msra.mxu1 %v952_v28  ;;  %835 = vmatpush.bf16.msrb.mxu0 %v1045_v27 }
 0x214   : > { %939 = vmatmul.msk.f32.gmra.mxu1 %vm457_vm3, %v456_v29 }
 0x21c   : > { %965 = vmatmul.msk.bf16.vlgmr.msra.gmra.mxu1 %vm612_vm4, %v581_v30 }
 0x289   : > { %v485_v43 = vpop.f32.mrf.mxu1 }
 0x28a   : > { %941 = vmatmul.msk.f32.vlgmr.msra.gmra.mxu2 %vm496_vm6, %v485_v43  ;;  %944 = vmatmul.msk.f32.vlgmr.msra.gmra.mxu3 %vm496_vm6, %v485_v43 }
 0x28b   : > { %947 = vmatmul.msk.f32.vlgmr.msra.gmra.mxu0 %vm496_vm6, %v485_v43 }
 0x291   : > { %v488_v46 = vpop.f32.mrf.mxu1 }
 0x292   : > { %942 = vmatmul.msk.f32.gmra.mxu2 %vm496_vm6, %v488_v46  ;;  %945 = vmatmul.msk.f32.gmra.mxu3 %vm496_vm6, %v488_v46 }
 0x293   : > { %948 = vmatmul.msk.f32.gmra.mxu0 %vm496_vm6, %v488_v46 }
 0x299   : > { %v625_v48 = vpop.f32.mrf.mxu1 }
 0x29a   : > { %966 = vmatmul.msk.bf16.vlgmr.msrb.gmra.mxu2 %vm612_vm4, %v581_v30  ;;  %v626_v52 = vadd.f32 %v625_v48, %v588_v50 }
 0x29c   : > { %v644_v54 = vmul.f32 %v626_v52, %v626_v52 }
 0x29e   : > { %v648_v57 = vmul.f32 %v644_v54, %v626_v52 }
 0x2a0   : > { %v652_v60 = vmul.f32 0.044715, %v648_v57 }
 0x2a1   : > { %v627_v51 = vpop.f32.mrf.mxu1 }
 0x2a2   : > { %v628_v53 = vadd.f32 %v627_v51, %v588_v50  ;;  %v656_v63 = vadd.f32 %v652_v60, %v626_v52 }
 0x2a4   : > { %v646_v55 = vmul.f32 %v628_v53, %v628_v53  ;;  %v660_v3 = vmul.f32 0.7978846, %v656_v63 }
 0x2a6   : > { %v650_v59 = vmul.f32 %v646_v55, %v628_v53  ;;  %1067 = vtanh.f32 %v660_v3 }
 0x2a8   : > { %v654_v61 = vmul.f32 0.044715, %v650_v59 }
 0x2aa   : > { %v658_v0 = vadd.f32 %v654_v61, %v628_v53 }
 0x2ac   : > { %v662_v4 = vmul.f32 0.7978846, %v658_v0  ;;  %v1068_v6 = vpop.eup %1067 }
 0x2ad   : > { %v668_v9 = vadd.f32 1.0, %v1068_v6 }
 0x2ae   : > { %1069 = vtanh.f32 %v662_v4 }
 0x2af   : > { %v672_v13 = vmul.f32 0.5, %v668_v9 }
 0x2b1   : > { %v676_v16 = vmul.f32 %v672_v13, %v626_v52 }
 0x2b4   : > { %v1070_v7 = vpop.eup %1069 }
 0x2b5   : > { %v670_v10 = vadd.f32 1.0, %v1070_v7 }
 0x2b7   : > { %v674_v14 = vmul.f32 0.5, %v670_v10 }
 0x2b9   : > { %v678_v17 = vmul.f32 %v674_v14, %v628_v53 }
 0x308   : > { %v575_v54 = vpop.f32.mrf.mxu0 }
 0x30d   : > { %v525_v12 = vpop.f32.mrf.mxu2  ;;  %v548_v43 = vpop.f32.mrf.mxu3 }
 0x30e   : > { %v680_v21 = vmul.f32 %v676_v16, %v525_v12 }
 0x310   : > { %v578_v55 = vpop.f32.mrf.mxu0 }
 0x315   : > { %v528_v19 = vpop.f32.mrf.mxu2  ;;  %v551_v50 = vpop.f32.mrf.mxu3 }
 0x316   : > { %v682_v22 = vmul.f32 %v678_v17, %v528_v19 }
 0x318   : > { %v684_v23 = vpack.c.bf16 %v682_v22, %v680_v21 }
 0x31a   : > { %822 = vmatmul.bf16.vlgmr.msrb.gmra.mxu3 %v684_v23 }
 0x31d   : > { %v639_v26 = vpop.f32.mrf.mxu2 }
 0x31e   : > { %v640_v28 = vadd.f32 %v639_v26, %v589_v25 }
 0x320   : > { %v645_v29 = vmul.f32 %v640_v28, %v640_v28 }
 0x322   : > { %v649_v30 = vmul.f32 %v645_v29, %v640_v28 }
 0x324   : > { %v653_v31 = vmul.f32 0.044715, %v649_v30 }
 0x325   : > { %v641_v32 = vpop.f32.mrf.mxu2 }
 0x326   : > { %v657_v33 = vadd.f32 %v653_v31, %v640_v28  ;;  %v642_v34 = vadd.f32 %v641_v32, %v589_v25 }
 0x328   : > { %v661_v35 = vmul.f32 0.7978846, %v657_v33  ;;  %v647_v36 = vmul.f32 %v642_v34, %v642_v34 }
 0x32a   : > { %1071 = vtanh.f32 %v661_v35  ;;  %v651_v37 = vmul.f32 %v647_v36, %v642_v34 }
 0x32c   : > { %v655_v38 = vmul.f32 0.044715, %v651_v37 }
 0x32e   : > { %v659_v39 = vadd.f32 %v655_v38, %v642_v34 }
 0x330   : > { %v1072_v40 = vpop.eup %1071  ;;  %v663_v41 = vmul.f32 0.7978846, %v659_v39 }
 0x331   : > { %v669_v42 = vadd.f32 1.0, %v1072_v40 }
 0x332   : > { %1073 = vtanh.f32 %v663_v41 }
 0x333   : > { %v673_v44 = vmul.f32 0.5, %v669_v42 }
 0x335   : > { %v677_v48 = vmul.f32 %v673_v44, %v640_v28 }
 0x337   : > { %v681_v51 = vmul.f32 %v677_v48, %v548_v43 }
 0x338   : > { %v1074_v45 = vpop.eup %1073 }
 0x339   : > { %v671_v46 = vadd.f32 1.0, %v1074_v45 }
 0x33b   : > { %v675_v47 = vmul.f32 0.5, %v671_v46 }
 0x33d   : > { %v679_v49 = vmul.f32 %v675_v47, %v642_v34 }
 0x33f   : > { %v683_v52 = vmul.f32 %v679_v49, %v551_v50 }
 0x341   : > { %v685_v53 = vpack.c.bf16 %v683_v52, %v681_v51 }
 0x343   : > { %836 = vmatmul.bf16.vlgmr.msrb.gmra.mxu0 %v685_v53 }
 0x39d   : > { %v823_v56 = vpop.f32.mrf.mxu3 }
 0x39e   : > { %v824_v57 = vadd.f32 %v823_v56, %v575_v54 }
 0x3a5   : > { %v825_v61 = vpop.f32.mrf.mxu3 }
 0x3a6   : > { %v826_v62 = vadd.f32 %v825_v61, %v578_v55 }
 0x3c0   : > { %v837_v58 = vpop.f32.mrf.mxu0 }
 0x3c1   : > { %v838_v59 = vadd.f32 %v837_v58, %v824_v57 }
 0x3c3   : > { %v842_v60 = vadd.f32 %v838_v59, %v1166_v2 }
 0x3c5   : > { %844 = vst.msk [vmem:[%s394_s12] sm:$0xff] %vm612_vm4, %v842_v60 }
 0x3c8   : > { %v839_v63 = vpop.f32.mrf.mxu0 }
 0x3c9   : > { %v840_v0 = vadd.f32 %v839_v63, %v826_v62 }
 0x3cb   : > { %v843_v3 = vadd.f32 %v840_v0, %v1163_v1 }
 0x3cd   : > { %845 = vst.msk [vmem:[%s394_s12 + $0x8] sm:$0xff] %vm612_vm4, %v843_v3 }
 0x3ce PF: > { %s22_s17 = sadd.s32 1, %s1081_s17  }
 0x3cf   : > { %p19_p5 = scmp.ge.s32.totalorder %s22_s17, 4  }
 0x3d1   :  { %21 = sbr.rel (!%p19_p5) target bundleno = 1 (0x1), region = 102 }

</bundles_post_ra>
